<compile_context>
chip_gen: v7x
topology: tpu7x:2x2x1
jax: 0.10.0
libtpu: 0.0.40
codegen_flags: <defaults>
</compile_context>

<pallas_src>
import jax
import jax.numpy as jnp
import numpy as np
from jax.experimental import pallas as pl
from jax.experimental.pallas import tpu as pltpu

# ---- Packed-slab layout (all blocks lane-padded to 128, zero-filled) ---------
LANE = 128          # lane width; hidden/output padded up to this
BPAD = 8            # sublane-padded batch
ROW_WIN = 0         # rows   0..127 : w_in  = wemb @ wih   (V valid rows)
ROW_WHH = 128       # rows 128..255 : whh                   (H valid rows)
ROW_W1 = 256        # rows 256..383 : w1                    (H valid rows)
ROW_W2 = 384        # rows 384..511 : w2                    (H valid rows, O valid cols)
ROW_BIAS = 512      # rows 512..519 : row0 = bih+bhh, row1 = b1, row2 = b2
SLAB_ROWS = 520


def char_rnn_kernel(ids_ref, w_ref, o_ref):
    TB = ids_ref.shape[0]                    # T * BPAD (time-major flattened)
    BP = o_ref.shape[0]                      # BPAD
    T = TB // BP

    # Static, sublane-aligned slices into the single packed weight slab.
    w_in = w_ref[ROW_WIN:ROW_WIN + LANE, :]          # [128,128] (rows >= V are zero)
    whh = w_ref[ROW_WHH:ROW_WHH + LANE, :]           # [128,128] (rows/cols >= H are zero)
    w1 = w_ref[ROW_W1:ROW_W1 + LANE, :]              # [128,128]
    w2 = w_ref[ROW_W2:ROW_W2 + LANE, :]              # [128,128] (cols >= O are zero)
    bias = w_ref[ROW_BIAS:ROW_BIAS + 8, :]           # [8,128]
    b_rnn = bias[0:1, :]
    b1 = bias[1:2, :]
    b2 = bias[2:3, :]

    # ---- Hoisted work (once, outside the recurrence) -------------------------
    # One-hot for all T*BPAD tokens; embedding + input projection folded into a
    # single matmul against the precomputed w_in.  (Out-of-range ids would give
    # a zero embedding row, unlike nn.Embedding which errors.)
    ids = ids_ref[...]                                                   # [T*BP, 1] int32
    onehot = (ids == jax.lax.broadcasted_iota(jnp.int32, (TB, LANE), 1)
              ).astype(jnp.float32)                                      # [T*BP, 128]
    xproj = jnp.dot(onehot, w_in,
                    preferred_element_type=jnp.float32) + b_rnn          # [T*BP, 128]

    # ---- Recurrence: only h @ whh + tanh on the serial path -------------------
    # T is small and static -> full static unroll; every per-step tensor is an
    # exact (8,128) vreg (padded lanes stay exactly zero through tanh).
    h = jnp.zeros((BP, LANE), jnp.float32)
    for t in range(T):
        pre = xproj[t * BP:(t + 1) * BP, :] + jnp.dot(
            h, whh, preferred_element_type=jnp.float32)
        h = jnp.tanh(pre)                           # last-step h == output[:, -1, :]

    # ---- FC head: fc[0] + ReLU, then fc[1] ------------------------------------
    y = jnp.maximum(
        jnp.dot(h, w1, preferred_element_type=jnp.float32) + b1, 0.0)
    # Lane-dense [8,128] store (no masked partial vst); wrapper slices [B, O].
    o_ref[...] = jnp.dot(y, w2, preferred_element_type=jnp.float32) + b2


def pack_params(params):
    """One-time parameter packing: fold wemb@wih and bih+bhh, pad to a single
    lane-padded f32 slab [SLAB_ROWS, 128].  Do this once at load time, not per call."""
    f32 = jnp.float32
    V, H = params["wemb"].shape
    O = params["w2"].shape[1]

    w_in = params["wemb"].astype(f32) @ params["wih"].astype(f32)        # [V, H]
    b_rnn = (params["bih"] + params["bhh"]).astype(f32)                  # [1, H]

    def pad_block(m):
        r, c = m.shape
        return jnp.zeros((LANE, LANE), f32).at[:r, :c].set(m.astype(f32))

    bias_block = jnp.zeros((8, LANE), f32)
    bias_block = bias_block.at[0, :H].set(b_rnn[0])
    bias_block = bias_block.at[1, :H].set(params["b1"][0].astype(f32))
    bias_block = bias_block.at[2, :O].set(params["b2"][0].astype(f32))

    slab = jnp.concatenate([
        pad_block(w_in),                  # rows   0..127
        pad_block(params["whh"]),         # rows 128..255
        pad_block(params["w1"]),          # rows 256..383
        pad_block(params["w2"]),          # rows 384..511
        bias_block,                       # rows 512..519
    ], axis=0)
    assert slab.shape == (SLAB_ROWS, LANE)
    return slab


def char_rnn_forward(x_ids, slab, out_size):
    """x_ids: [B, T] int token ids.  slab: packed params.  Returns [B, O] f32 logits."""
    B, T = x_ids.shape
    # Time-major ids, batch padded to 8 sublanes with a valid dummy token (0);
    # padded rows are computed and discarded by the final slice.
    ids_tm = jnp.zeros((T, BPAD), jnp.int32).at[:, :B].set(
        jnp.transpose(x_ids.astype(jnp.int32)))
    ids_tm = ids_tm.reshape(T * BPAD, 1)

    vmem = pl.BlockSpec(memory_space=pltpu.MemorySpace.VMEM)
    # Single grid point: ~270 KB of operands, everything resident in VMEM.
    out_pad = pl.pallas_call(
        char_rnn_kernel,
        out_shape=jax.ShapeDtypeStruct((BPAD, LANE), jnp.float32),
        in_specs=[vmem, vmem],
        out_specs=vmem,
    )(ids_tm, slab)
    return out_pad[:B, :out_size]


def reference_forward(x_ids, params):
    """Pure-JAX f32 reference matching the PyTorch forward semantics."""
    B, T = x_ids.shape
    H = params["wemb"].shape[1]
    wemb = params["wemb"].astype(jnp.float32)
    emb = wemb[x_ids]                                                    # [B, T, H]
    h = jnp.zeros((B, H), jnp.float32)
    for t in range(T):
        h = jnp.tanh(emb[:, t] @ params["wih"].astype(jnp.float32) + params["bih"]
                     + h @ params["whh"].astype(jnp.float32) + params["bhh"])
    y = jax.nn.relu(h @ params["w1"].astype(jnp.float32) + params["b1"])
    return y @ params["w2"].astype(jnp.float32) + params["b2"]


def make_params(key, vocab, hidden, out_size):
    ks = jax.random.split(key, 8)
    s = 0.1
    return {
        "wemb": s * jax.random.normal(ks[0], (vocab, hidden), jnp.float32),
        "wih":  s * jax.random.normal(ks[1], (hidden, hidden), jnp.float32),
        "whh":  s * jax.random.normal(ks[2], (hidden, hidden), jnp.float32),
        "bih":  s * jax.random.normal(ks[3], (1, hidden), jnp.float32),
        "bhh":  s * jax.random.normal(ks[4], (1, hidden), jnp.float32),
        "w1":   s * jax.random.normal(ks[5], (hidden, hidden), jnp.float32),
        "b1":   s * jax.random.normal(ks[6], (1, hidden), jnp.float32),
        "w2":   s * jax.random.normal(ks[7], (hidden, out_size), jnp.float32),
        "b2":   jnp.zeros((1, out_size), jnp.float32),
    }


if __name__ == "__main__":
    # Small shapes consistent with the module: vocab=16, hidden=32, output=16,
    # batch=2, seq=8, rnn_type='RNN', fc_layers=2.
    VOCAB, HIDDEN, OUT = 16, 32, 16
    B, T = 2, 8

    key = jax.random.PRNGKey(0)
    k_params, k_x = jax.random.split(key)
    params = make_params(k_params, VOCAB, HIDDEN, OUT)
    x_ids = jax.random.randint(k_x, (B, T), 0, VOCAB, dtype=jnp.int32)

    slab = jax.block_until_ready(pack_params(params))   # one-time parameter packing

    out = char_rnn_forward(x_ids, slab, OUT)
    out = jax.block_until_ready(out)

    ref = reference_forward(x_ids, params)
    # All-f32 path; tolerance left loose enough to be robust to MXU matmul
    # rounding, far tighter than the old bf16 path needed.
    np.testing.assert_allclose(np.asarray(out), np.asarray(ref), rtol=1e-2, atol=1e-2)
    print("KERNEL_OK")
</pallas_src>

<mosaic_0001>
module attributes {stable_mosaic.version = 11 : i64} {
  func.func @char_rnn_kernel(%arg0: memref<64x1xi32, #tpu.memory_space<vmem>>, %arg1: memref<520x128xf32, #tpu.memory_space<vmem>>, %arg2: memref<8x128xf32, #tpu.memory_space<vmem>>) attributes {dimension_semantics = [], scalar_prefetch = 0 : i64, scratch_operands = 0 : i64, tpu.core_type = #tpu.core_type<tc>} {
    %c0 = arith.constant 0 : index
    %c0_0 = arith.constant 0 : index
    %0 = vector.load %arg1[%c0, %c0_0] : memref<520x128xf32, #tpu.memory_space<vmem>>, vector<128x128xf32>
    %c128 = arith.constant 128 : index
    %c0_1 = arith.constant 0 : index
    %1 = vector.load %arg1[%c128, %c0_1] : memref<520x128xf32, #tpu.memory_space<vmem>>, vector<128x128xf32>
    %c256 = arith.constant 256 : index
    %c0_2 = arith.constant 0 : index
    %2 = vector.load %arg1[%c256, %c0_2] : memref<520x128xf32, #tpu.memory_space<vmem>>, vector<128x128xf32>
    %c384 = arith.constant 384 : index
    %c0_3 = arith.constant 0 : index
    %3 = vector.load %arg1[%c384, %c0_3] : memref<520x128xf32, #tpu.memory_space<vmem>>, vector<128x128xf32>
    %c512 = arith.constant 512 : index
    %c0_4 = arith.constant 0 : index
    %4 = vector.load %arg1[%c512, %c0_4] : memref<520x128xf32, #tpu.memory_space<vmem>>, vector<8x128xf32>
    %5 = vector.extract_strided_slice %4 {offsets = [0, 0], sizes = [1, 128], strides = [1, 1]} : vector<8x128xf32> to vector<1x128xf32>
    %6 = vector.extract_strided_slice %4 {offsets = [1, 0], sizes = [1, 128], strides = [1, 1]} : vector<8x128xf32> to vector<1x128xf32>
    %7 = vector.extract_strided_slice %4 {offsets = [2, 0], sizes = [1, 128], strides = [1, 1]} : vector<8x128xf32> to vector<1x128xf32>
    %c0_5 = arith.constant 0 : index
    %c0_6 = arith.constant 0 : index
    %8 = vector.load %arg0[%c0_5, %c0_6] : memref<64x1xi32, #tpu.memory_space<vmem>>, vector<64x1xi32>
    %9 = tpu.iota {dimensions = array<i32: 1>} : vector<64x128xi32>
    %10 = vector.broadcast %8 : vector<64x1xi32> to vector<64x128xi32>
    %11 = arith.cmpi eq, %10, %9 : vector<64x128xi32>
    %12 = arith.extui %11 : vector<64x128xi1> to vector<64x128xi32>
    %13 = arith.sitofp %12 : vector<64x128xi32> to vector<64x128xf32>
    %cst = arith.constant dense<0.000000e+00> : vector<64x128xf32>
    %14 = tpu.matmul %13, %0, %cst {dimension_numbers = #tpu.dot_dimension_numbers<[1], [0], [0], [1], [0, 0, 1, 1], [], []>} : vector<64x128xf32>, vector<128x128xf32>, vector<64x128xf32> -> vector<64x128xf32>
    %15 = vector.broadcast %5 : vector<1x128xf32> to vector<64x128xf32>
    %16 = arith.addf %14, %15 : vector<64x128xf32>
    %cst_7 = arith.constant 0.000000e+00 : f32
    %17 = vector.broadcast %cst_7 : f32 to vector<8x128xf32>
    %18 = vector.extract_strided_slice %16 {offsets = [0, 0], sizes = [8, 128], strides = [1, 1]} : vector<64x128xf32> to vector<8x128xf32>
    %cst_8 = arith.constant dense<0.000000e+00> : vector<8x128xf32>
    %19 = tpu.matmul %17, %1, %cst_8 {dimension_numbers = #tpu.dot_dimension_numbers<[1], [0], [0], [1], [0, 0, 1, 1], [], []>} : vector<8x128xf32>, vector<128x128xf32>, vector<8x128xf32> -> vector<8x128xf32>
    %20 = arith.addf %18, %19 : vector<8x128xf32>
    %21 = math.tanh %20 : vector<8x128xf32>
    %22 = vector.extract_strided_slice %16 {offsets = [8, 0], sizes = [8, 128], strides = [1, 1]} : vector<64x128xf32> to vector<8x128xf32>
    %cst_9 = arith.constant dense<0.000000e+00> : vector<8x128xf32>
    %23 = tpu.matmul %21, %1, %cst_9 {dimension_numbers = #tpu.dot_dimension_numbers<[1], [0], [0], [1], [0, 0, 1, 1], [], []>} : vector<8x128xf32>, vector<128x128xf32>, vector<8x128xf32> -> vector<8x128xf32>
    %24 = arith.addf %22, %23 : vector<8x128xf32>
    %25 = math.tanh %24 : vector<8x128xf32>
    %26 = vector.extract_strided_slice %16 {offsets = [16, 0], sizes = [8, 128], strides = [1, 1]} : vector<64x128xf32> to vector<8x128xf32>
    %cst_10 = arith.constant dense<0.000000e+00> : vector<8x128xf32>
    %27 = tpu.matmul %25, %1, %cst_10 {dimension_numbers = #tpu.dot_dimension_numbers<[1], [0], [0], [1], [0, 0, 1, 1], [], []>} : vector<8x128xf32>, vector<128x128xf32>, vector<8x128xf32> -> vector<8x128xf32>
    %28 = arith.addf %26, %27 : vector<8x128xf32>
    %29 = math.tanh %28 : vector<8x128xf32>
    %30 = vector.extract_strided_slice %16 {offsets = [24, 0], sizes = [8, 128], strides = [1, 1]} : vector<64x128xf32> to vector<8x128xf32>
    %cst_11 = arith.constant dense<0.000000e+00> : vector<8x128xf32>
    %31 = tpu.matmul %29, %1, %cst_11 {dimension_numbers = #tpu.dot_dimension_numbers<[1], [0], [0], [1], [0, 0, 1, 1], [], []>} : vector<8x128xf32>, vector<128x128xf32>, vector<8x128xf32> -> vector<8x128xf32>
    %32 = arith.addf %30, %31 : vector<8x128xf32>
    %33 = math.tanh %32 : vector<8x128xf32>
    %34 = vector.extract_strided_slice %16 {offsets = [32, 0], sizes = [8, 128], strides = [1, 1]} : vector<64x128xf32> to vector<8x128xf32>
    %cst_12 = arith.constant dense<0.000000e+00> : vector<8x128xf32>
    %35 = tpu.matmul %33, %1, %cst_12 {dimension_numbers = #tpu.dot_dimension_numbers<[1], [0], [0], [1], [0, 0, 1, 1], [], []>} : vector<8x128xf32>, vector<128x128xf32>, vector<8x128xf32> -> vector<8x128xf32>
    %36 = arith.addf %34, %35 : vector<8x128xf32>
    %37 = math.tanh %36 : vector<8x128xf32>
    %38 = vector.extract_strided_slice %16 {offsets = [40, 0], sizes = [8, 128], strides = [1, 1]} : vector<64x128xf32> to vector<8x128xf32>
    %cst_13 = arith.constant dense<0.000000e+00> : vector<8x128xf32>
    %39 = tpu.matmul %37, %1, %cst_13 {dimension_numbers = #tpu.dot_dimension_numbers<[1], [0], [0], [1], [0, 0, 1, 1], [], []>} : vector<8x128xf32>, vector<128x128xf32>, vector<8x128xf32> -> vector<8x128xf32>
    %40 = arith.addf %38, %39 : vector<8x128xf32>
    %41 = math.tanh %40 : vector<8x128xf32>
    %42 = vector.extract_strided_slice %16 {offsets = [48, 0], sizes = [8, 128], strides = [1, 1]} : vector<64x128xf32> to vector<8x128xf32>
    %cst_14 = arith.constant dense<0.000000e+00> : vector<8x128xf32>
    %43 = tpu.matmul %41, %1, %cst_14 {dimension_numbers = #tpu.dot_dimension_numbers<[1], [0], [0], [1], [0, 0, 1, 1], [], []>} : vector<8x128xf32>, vector<128x128xf32>, vector<8x128xf32> -> vector<8x128xf32>
    %44 = arith.addf %42, %43 : vector<8x128xf32>
    %45 = math.tanh %44 : vector<8x128xf32>
    %46 = vector.extract_strided_slice %16 {offsets = [56, 0], sizes = [8, 128], strides = [1, 1]} : vector<64x128xf32> to vector<8x128xf32>
    %cst_15 = arith.constant dense<0.000000e+00> : vector<8x128xf32>
    %47 = tpu.matmul %45, %1, %cst_15 {dimension_numbers = #tpu.dot_dimension_numbers<[1], [0], [0], [1], [0, 0, 1, 1], [], []>} : vector<8x128xf32>, vector<128x128xf32>, vector<8x128xf32> -> vector<8x128xf32>
    %48 = arith.addf %46, %47 : vector<8x128xf32>
    %49 = math.tanh %48 : vector<8x128xf32>
    %cst_16 = arith.constant dense<0.000000e+00> : vector<8x128xf32>
    %50 = tpu.matmul %49, %2, %cst_16 {dimension_numbers = #tpu.dot_dimension_numbers<[1], [0], [0], [1], [0, 0, 1, 1], [], []>} : vector<8x128xf32>, vector<128x128xf32>, vector<8x128xf32> -> vector<8x128xf32>
    %51 = vector.broadcast %6 : vector<1x128xf32> to vector<8x128xf32>
    %52 = arith.addf %50, %51 : vector<8x128xf32>
    %cst_17 = arith.constant 0.000000e+00 : f32
    %53 = vector.broadcast %cst_17 : f32 to vector<8x128xf32>
    %54 = arith.maximumf %52, %53 : vector<8x128xf32>
    %cst_18 = arith.constant dense<0.000000e+00> : vector<8x128xf32>
    %55 = tpu.matmul %54, %3, %cst_18 {dimension_numbers = #tpu.dot_dimension_numbers<[1], [0], [0], [1], [0, 0, 1, 1], [], []>} : vector<8x128xf32>, vector<128x128xf32>, vector<8x128xf32> -> vector<8x128xf32>
    %56 = vector.broadcast %7 : vector<1x128xf32> to vector<8x128xf32>
    %57 = arith.addf %55, %56 : vector<8x128xf32>
    %c0_19 = arith.constant 0 : index
    %c0_20 = arith.constant 0 : index
    %58 = vector.load %arg2[%c0_19, %c0_20] : memref<8x128xf32, #tpu.memory_space<vmem>>, vector<8x128xf32>
    tpu.vector_store %arg2[%c0_19, %c0_20], %57 {strides = array<i32>} : memref<8x128xf32, #tpu.memory_space<vmem>>, vector<8x128xf32>,
    return
  }
}

</mosaic_0001>

<bundles_post_ra>
// kernel: tpu_custom_call.1
= control target key start
LH: loop header
LB: loop body
LE: loop exit
PB: predicated region body
PF: predicated region fallthrough
CT: control target
= control target key end

     0   :  { %7 = vsyncpa [#allocation3], 0  ;;  %s2228_s0 = inlined_call_operand.vmem [shape: s32[64,1], index: 0, kind: input, shape index: {}]   ;;  %s2229_s1 = inlined_call_operand.hbm [shape: f32[520,128], index: 1, kind: input, shape index: {}]   ;;  %s2230_s2 = inlined_call_operand.hbm [shape: f32[8,128], index: 2, kind: output, shape index: {}]  }
   0x1   :  { %8 = vsyncpa [#allocation4], 0  ;;  %s1950_s9 = smov [#allocation2]   ;;  %s1902_s13 = scalar_lea.hbm %s2229_s1, 8320 }
   0x2   :  { %s16_s10 = sshll.u32 %s1950_s9, 4  ;;  %p1903_p0 = scmp.ne.s32.totalorder %s2229_s1, %s1902_s13  ;;  %s17_s10 = int_to_ptr.vmem [resolvable:$true] %s16_s10 }
   0x3   :  { %p1906_p1 = scmp.lt.u32.totalorder %s1902_s13, %s2229_s1 }
   0x5   :  { %p1908_p2 = pnand %p1906_p1, %p1903_p0 }
   0x7   :  { %1911 = shalt.err (!%p1908_p2)
}
   0x8   :  { %s1912_s18 = scalar_lea.vmem %s17_s10, 8320  ;;  %p1917_p4 = scmp.lt.s32.totalorder %s17_s10, %s17_s10 }
   0x9   :  { %p1913_p3 = scmp.ne.s32.totalorder %s17_s10, %s1912_s18  ;;  %p1918_p5 = scmp.lt.s32.totalorder %s1912_s18, %s1912_s18 }
   0xb   :  { %p1919_p6 = por %p1918_p5, %p1917_p4 }
   0xd   :  { %p1920_p7 = pnand %p1919_p6, %p1913_p3 }
   0xf   :  { %1923 = shalt.err (!%p1920_p7)
}
  0x10   :  { %s1951_s19 = smov 128   ;;  %s1952_s20 = smov 8  }
  0x11   :  { %22 = dma.hbm_to_vmem [thread:$0]  %s2229_s1, 8320, %s17_s10, [#allocation3], %s1951_s19, %s1951_s19, %s1952_s20  }
  0x12   :  { %1946 = dma.done.wait [#allocation3], 8320  }
  0x13   :  { %1947 = vsyncadd [#allocation3], 4294958976  ;;  %v1953_v0 = vmov 0   ;;  %v1954_v1 = vmov 0.0|0.0   ;;  %v91_v2 = vld [vmem:[%s2228_s0] sm:$0xff]  ;;  %v93_v3 = vld [vmem:[%s2228_s0 + $0x10] sm:$0xff]  ;;  %v99_v59 = vlaneseq }
  0x14   :  { %1884 = vset.pattern.permute.xlu0 %v1953_v0  ;;  %1885 = vset.pattern.permute.xlu1 %v1953_v0  ;;  %v92_v4 = vld [vmem:[%s2228_s0 + $0x8] sm:$0xff]  ;;  %v94_v5 = vld [vmem:[%s2228_s0 + $0x18] sm:$0xff]  ;;  %v26_v6 = vld [vmem:[#allocation2] sm:$0xff]  ;;  %vm1955_vm0 = vmmov 0   ;;  %v1956_v25 = vmov 0.0   ;;  %v1957_v63 = vmov 1.0  }
  0x15   :  { %1635 = vmatprep.subr.bf16.mxu1 %v1954_v1  ;;  %102 = vperm.xlu0 %1884, %v91_v2   ;;  %v27_v7 = vld [vmem:[#allocation2 + $0x8] sm:$0xff]  ;;  %v42_v9 = vld [vmem:[#allocation2 + $0x80] sm:$0xff]  ;;  %v28_v11 = vld [vmem:[#allocation2 + $0x10] sm:$0xff]  ;;  %v100_v60 = vand.u32 127, %v99_v59 }
  0x16   :  { %108 = vperm.xlu1 %1885, %v93_v3   ;;  %v1603_v8 = vpack.c.bf16 %v27_v7, %v26_v6  ;;  %v43_v10 = vld [vmem:[#allocation2 + $0x88] sm:$0xff]  ;;  %v29_v13 = vld [vmem:[#allocation2 + $0x18] sm:$0xff]  ;;  %v44_v14 = vld [vmem:[#allocation2 + $0x90] sm:$0xff]  ;;  %1285 = vmatprep.mubr.msk.f32.mxu1 %vm1955_vm0, %v1956_v25 }
  0x17   :  { %v1999_v12 = vpack.c.bf16 %v43_v10, %v42_v9  ;;  %v45_v15 = vld [vmem:[#allocation2 + $0x98] sm:$0xff]  ;;  %v1607_v16 = vpack.c.bf16 %v29_v13, %v28_v11  ;;  %v30_v17 = vld [vmem:[#allocation2 + $0x20] sm:$0xff]  ;;  %v31_v18 = vld [vmem:[#allocation2 + $0x28] sm:$0xff]  ;;  %v2083_v9 = vshrl.u32 %v99_v59, 7 }
  0x18   :  { %v95_v19 = vld [vmem:[%s2228_s0 + $0x20] sm:$0xff]  ;;  %v96_v20 = vld [vmem:[%s2228_s0 + $0x28] sm:$0xff]  ;;  %1604 = vmatprep.subr.bf16.mxu0 %v1603_v8  ;;  %v2008_v21 = vpack.c.bf16 %v45_v15, %v44_v14  ;;  %v1611_v24 = vpack.c.bf16 %v31_v18, %v30_v17  ;;  %v32_v26 = vld [vmem:[#allocation2 + $0x30] sm:$0xff] }
  0x19   :  { %105 = vperm.xlu0 %1884, %v92_v4   ;;  %1637 = vmatpush3.bf16.msra.mxu1 %v1999_v12  ;;  %v46_v22 = vld [vmem:[#allocation2 + $0xa0] sm:$0xff]  ;;  %v47_v23 = vld [vmem:[#allocation2 + $0xa8] sm:$0xff]  ;;  %v33_v27 = vld [vmem:[#allocation2 + $0x38] sm:$0xff]  ;;  %v151_v10 = vsub.s32 0, %v2083_v9 }
  0x1a   :  { %111 = vperm.xlu1 %1885, %v94_v5   ;;  %1606 = vmatpush3.bf16.msra.mxu0 %v1603_v8  ;;  %v97_v28 = vld [vmem:[%s2228_s0 + $0x30] sm:$0xff]  ;;  %v2017_v29 = vpack.c.bf16 %v47_v23, %v46_v22  ;;  %v49_v31 = vld [vmem:[#allocation2 + $0xb8] sm:$0xff]  ;;  %v1615_v32 = vpack.c.bf16 %v33_v27, %v32_v26  ;;  %v34_v33 = vld [vmem:[#allocation2 + $0x40] sm:$0xff] }
  0x1b   :  { %1638 = vmatprep.subr.bf16.mxu1 %v1954_v1  ;;  %1608 = vmatprep.subr.bf16.mxu0 %v1607_v16  ;;  %v48_v30 = vld [vmem:[#allocation2 + $0xb0] sm:$0xff]  ;;  %v35_v34 = vld [vmem:[#allocation2 + $0x48] sm:$0xff]  ;;  %v50_v36 = vld [vmem:[#allocation2 + $0xc0] sm:$0xff] }
  0x1c   :  { %v2021_v35 = vpack.c.bf16 %v49_v31, %v48_v30  ;;  %v51_v37 = vld [vmem:[#allocation2 + $0xc8] sm:$0xff]  ;;  %v98_v38 = vld [vmem:[%s2228_s0 + $0x38] sm:$0xff]  ;;  %v1619_v39 = vpack.c.bf16 %v35_v34, %v34_v33  ;;  %v36_v40 = vld [vmem:[#allocation2 + $0x50] sm:$0xff]  ;;  %s1958_s0 = smov [#allocation5]  }
  0x1d   :  { %114 = vperm.xlu0 %1884, %v95_v19   ;;  %1640 = vmatpush3.bf16.msra.mxu1 %v2008_v21  ;;  %v37_v41 = vld [vmem:[#allocation2 + $0x58] sm:$0xff]  ;;  %v2028_v42 = vpack.c.bf16 %v51_v37, %v50_v36  ;;  %v52_v43 = vld [vmem:[#allocation2 + $0xd0] sm:$0xff]  ;;  %v38_v46 = vld [vmem:[#allocation2 + $0x60] sm:$0xff]  ;;  %s990_s10 = sshll.u32 %s1958_s0, 4  ;;  %s991_s10 = int_to_ptr.vmem [resolvable:$true] %s990_s10 }
  0x1e   :  { %117 = vperm.xlu1 %1885, %v96_v20   ;;  %1610 = vmatpush3.bf16.msra.mxu0 %v1607_v16  ;;  %v53_v44 = vld [vmem:[#allocation2 + $0xd8] sm:$0xff]  ;;  %v1623_v45 = vpack.c.bf16 %v37_v41, %v36_v40  ;;  %v39_v47 = vld [vmem:[#allocation2 + $0x68] sm:$0xff]  ;;  %v54_v49 = vld [vmem:[#allocation2 + $0xe0] sm:$0xff]  ;;  %s1924_s11 = scalar_lea.vmem %s991_s10, 128  ;;  %p1929_p9 = scmp.lt.s32.totalorder %s991_s10, %s991_s10 }
  0x1f   :  { %1641 = vmatprep.subr.bf16.mxu1 %v1954_v1  ;;  %1612 = vmatprep.subr.bf16.mxu0 %v1611_v24  ;;  %v2032_v48 = vpack.c.bf16 %v53_v44, %v52_v43  ;;  %v55_v50 = vld [vmem:[#allocation2 + $0xe8] sm:$0xff]  ;;  %v1627_v51 = vpack.c.bf16 %v39_v47, %v38_v46  ;;  %v40_v52 = vld [vmem:[#allocation2 + $0x70] sm:$0xff]  ;;  %v41_v53 = vld [vmem:[#allocation2 + $0x78] sm:$0xff]  ;;  %p1925_p8 = scmp.ne.s32.totalorder %s991_s10, %s1924_s11  ;;  %p1930_p10 = scmp.lt.s32.totalorder %s1924_s11, %s1924_s11 }
  0x20   :  { %v2036_v54 = vpack.c.bf16 %v55_v50, %v54_v49  ;;  %v56_v55 = vld [vmem:[#allocation2 + $0xf0] sm:$0xff]  ;;  %v57_v56 = vld [vmem:[#allocation2 + $0xf8] sm:$0xff]  ;;  %v1631_v57 = vpack.c.bf16 %v41_v53, %v40_v52  ;;  %v2086_v11 = vld [vmem:[#allocation2 + $0x200] sm:$0xff] }
  0x21   :  { %120 = vperm.xlu0 %1884, %v97_v28   ;;  %1643 = vmatpush3.bf16.msra.mxu1 %v2017_v29  ;;  %v2040_v58 = vpack.c.bf16 %v57_v56, %v56_v55  ;;  %v152_v13 = vrot.slane %v2086_v11, %v151_v10  ;;  %v60_v55 = vld [vmem:[#allocation2 + $0x110] sm:$0xff]  ;;  %v61_v56 = vld [vmem:[#allocation2 + $0x118] sm:$0xff]  ;;  %v63_v59 = vld [vmem:[#allocation2 + $0x128] sm:$0xff]  ;;  %p1931_p11 = por %p1930_p10, %p1929_p9 }
  0x22   :  { %1614 = vmatpush3.bf16.msra.mxu0 %v1611_v24  ;;  %1644 = vmatprep.subr.bf16.mxu1 %v1954_v1  ;;  %v69_v10 = vld [vmem:[#allocation2 + $0x158] sm:$0xff] }
  0x23   :  { %1616 = vmatprep.subr.bf16.mxu0 %v1615_v32  ;;  %123 = vperm.xlu1 %1885, %v98_v38   ;;  %p1932_p12 = pnand %p1931_p11, %p1925_p8 }
  0x25   :  { %1646 = vmatpush3.bf16.msra.mxu1 %v2021_v35 }
  0x26   :  { %1618 = vmatpush3.bf16.msra.mxu0 %v1615_v32  ;;  %1647 = vmatprep.subr.bf16.mxu1 %v1954_v1 }
  0x27   :  { %1620 = vmatprep.subr.bf16.mxu0 %v1619_v39 }
  0x29   :  { %1649 = vmatpush3.bf16.msra.mxu1 %v2028_v42 }
  0x2a   :  { %1622 = vmatpush3.bf16.msra.mxu0 %v1619_v39  ;;  %1650 = vmatprep.subr.bf16.mxu1 %v1954_v1 }
  0x2b   :  { %1624 = vmatprep.subr.bf16.mxu0 %v1623_v45 }
  0x2d   :  { %1652 = vmatpush3.bf16.msra.mxu1 %v2032_v48 }
  0x2e   :  { %1626 = vmatpush3.bf16.msra.mxu0 %v1623_v45  ;;  %1653 = vmatprep.subr.bf16.mxu1 %v1954_v1 }
  0x2f   :  { %1628 = vmatprep.subr.bf16.mxu0 %v1627_v51 }
  0x31   :  { %1655 = vmatpush3.bf16.msra.mxu1 %v2036_v54 }
  0x32   :  { %1630 = vmatpush3.bf16.msra.mxu0 %v1627_v51  ;;  %1656 = vmatprep.subr.bf16.mxu1 %v1954_v1 }
  0x33   :  { %1632 = vmatprep.subr.bf16.mxu0 %v1631_v57 }
  0x35   :  { %1658 = vmatpush3.bf16.msra.mxu1 %v2040_v58 }
  0x36   :  { %1634 = vmatpush3.bf16.msra.mxu0 %v1631_v57  ;;  %1683 = vmatprep.subr.bf16.mxu1 %v1954_v1  ;;  %v1831_v57 = vpack.c.bf16 %v61_v56, %v60_v55 }
  0x37   :  { %1659 = vmatprep.subr.bf16.mxu0 %v1954_v1 }
  0x38   :  { %1286 = vmatmul.mubr.f32.vlgmr.msra.gmra.mrb[0].mxu1 %v1956_v25 }
  0x39   :  { %1685 = vmatpush3.bf16.msra.mxu1 %v1999_v12  ;;  %1355 = vmatprep.mubr.msk.f32.mxu1 %vm1955_vm0, %v1956_v25 }
  0x3a   :  { %1686 = vmatprep.subr.bf16.mxu1 %v1954_v1 }
  0x3d   :  { %1688 = vmatpush3.bf16.msra.mxu1 %v2008_v21 }
  0x3e   :  { %1689 = vmatprep.subr.bf16.mxu1 %v1954_v1 }
  0x41   :  { %1691 = vmatpush3.bf16.msra.mxu1 %v2017_v29 }
  0x42   :  { %1692 = vmatprep.subr.bf16.mxu1 %v1954_v1 }
  0x45   :  { %1694 = vmatpush3.bf16.msra.mxu1 %v2021_v35 }
  0x46   :  { %1695 = vmatprep.subr.bf16.mxu1 %v1954_v1 }
  0x49   :  { %1697 = vmatpush3.bf16.msra.mxu1 %v2028_v42 }
  0x4a   :  { %1698 = vmatprep.subr.bf16.mxu1 %v1954_v1 }
  0x4d   :  { %1700 = vmatpush3.bf16.msra.mxu1 %v2032_v48 }
  0x4e   :  { %1701 = vmatprep.subr.bf16.mxu1 %v1954_v1 }
  0x51   :  { %1703 = vmatpush3.bf16.msra.mxu1 %v2036_v54 }
  0x52   :  { %1704 = vmatprep.subr.bf16.mxu1 %v1954_v1 }
  0x55   :  { %1706 = vmatpush3.bf16.msra.mxu1 %v2040_v58 }
  0x56   :  { %1731 = vmatprep.subr.bf16.mxu1 %v1954_v1 }
  0x94   :  { %v103_v61 = vpop.permute.xlu0 %102 }
  0x95   :  { %v109_v62 = vpop.permute.xlu1 %108  ;;  %vm125_vm1 = vcmp.eq.s32.totalorder %v103_v61, %v100_v60  ;;  %v64_v61 = vld [vmem:[#allocation2 + $0x130] sm:$0xff] }
  0x96   :  { %1241 = vmatprep.mubr.msk.f32.mxu0 %vm125_vm1, %v1957_v63  ;;  %vm127_vm2 = vcmp.eq.s32.totalorder %v109_v62, %v100_v60  ;;  %v65_v62 = vld [vmem:[#allocation2 + $0x138] sm:$0xff] }
  0x98   :  { %v106_v0 = vpop.permute.xlu0 %105 }
  0x99   :  { %v112_v2 = vpop.permute.xlu1 %111  ;;  %vm126_vm3 = vcmp.eq.s32.totalorder %v106_v0, %v100_v60  ;;  %v66_v0 = vld [vmem:[#allocation2 + $0x140] sm:$0xff] }
  0x9a   :  { %1242 = vmatmul.mubr.msk.f32.vlgmr.msra.gmra.mrb[0].mxu0 %vm126_vm3, %v1957_v63  ;;  %vm128_vm4 = vcmp.eq.s32.totalorder %v112_v2, %v100_v60  ;;  %v67_v2 = vld [vmem:[#allocation2 + $0x148] sm:$0xff] }
  0x9b   :  { %1244 = vmatprep.mubr.msk.f32.mxu0 %vm127_vm2, %v1957_v63  ;;  %1661 = vmatpush3.bf16.msra.mxu0 %v1999_v12 }
  0x9c   :  { %v115_v3 = vpop.permute.xlu0 %114  ;;  %1662 = vmatprep.subr.bf16.mxu0 %v1954_v1 }
  0x9d   :  { %v118_v4 = vpop.permute.xlu1 %117  ;;  %vm129_vm5 = vcmp.eq.s32.totalorder %v115_v3, %v100_v60  ;;  %v1840_v3 = vpack.c.bf16 %v67_v2, %v66_v0 }
  0x9e   :  { %1245 = vmatmul.mubr.msk.f32.gmra.mrb[2].mxu0 %vm128_vm4, %v1957_v63  ;;  %vm130_vm6 = vcmp.eq.s32.totalorder %v118_v4, %v100_v60 }
  0x9f   :  { %1247 = vmatprep.mubr.msk.f32.mxu0 %vm129_vm5, %v1957_v63  ;;  %1664 = vmatpush3.bf16.msra.mxu0 %v2008_v21 }
  0xa0   :  { %v121_v5 = vpop.permute.xlu0 %120  ;;  %1665 = vmatprep.subr.bf16.mxu0 %v1954_v1 }
  0xa1   :  { %vm131_vm7 = vcmp.eq.s32.totalorder %v121_v5, %v100_v60 }
  0xa2   :  { %1248 = vmatmul.mubr.msk.f32.gmra.mrb[4].mxu0 %vm130_vm6, %v1957_v63  ;;  %v124_v6 = vpop.permute.xlu1 %123 }
  0xa3   :  { %1250 = vmatprep.mubr.msk.f32.mxu0 %vm131_vm7, %v1957_v63  ;;  %1667 = vmatpush3.bf16.msra.mxu0 %v2017_v29  ;;  %vm132_vm8 = vcmp.eq.s32.totalorder %v124_v6, %v100_v60 }
  0xa4   :  { %1668 = vmatprep.subr.bf16.mxu0 %v1954_v1 }
  0xa6   :  { %1251 = vmatmul.mubr.msk.f32.gmra.mrb[6].mxu0 %vm132_vm8, %v1957_v63  ;;  %v1837_v63 = vpack.c.bf16 %v65_v62, %v64_v61 }
  0xa7   :  { %1670 = vmatpush3.bf16.msra.mxu0 %v2021_v35  ;;  %1320 = vmatprep.mubr.msk.f32.mxu0 %vm1955_vm0, %v1956_v25 }
  0xa8   :  { %1671 = vmatprep.subr.bf16.mxu0 %v1954_v1 }
  0xab   :  { %1673 = vmatpush3.bf16.msra.mxu0 %v2028_v42 }
  0xac   :  { %1674 = vmatprep.subr.bf16.mxu0 %v1954_v1 }
  0xaf   :  { %1676 = vmatpush3.bf16.msra.mxu0 %v2032_v48 }
  0xb0   :  { %1677 = vmatprep.subr.bf16.mxu0 %v1954_v1 }
  0xb3   :  { %1679 = vmatpush3.bf16.msra.mxu0 %v2036_v54 }
  0xb4   :  { %1680 = vmatprep.subr.bf16.mxu0 %v1954_v1 }
  0xb7   :  { %1682 = vmatpush3.bf16.msra.mxu0 %v2040_v58 }
  0xb8   :  { %1707 = vmatprep.subr.bf16.mxu0 %v1954_v1 }
 0x10b   :  { %v324_v7 = vpop.f32.mrb[0].mxu1 }
 0x10c   :  { %v1287_v8 = vpop.f32.mrb[1].mxu1 }
 0x10d   :  { %v68_v8 = vld [vmem:[#allocation2 + $0x150] sm:$0xff] }
 0x16d   :  { %v1243_v14 = vpop.f32.mrb[0].mxu0 }
 0x16e   :  { %v225_v15 = vadd.f32 %v1243_v14, %v152_v13  ;;  %v219_v16 = vpop.f32.mrb[1].mxu0  ;;  %v70_v14 = vld [vmem:[#allocation2 + $0x160] sm:$0xff] }
 0x16f   :  { %v220_v17 = vadd.f32 %v219_v16, %v152_v13 }
 0x171   :  { %v328_v18 = vadd.f32 %v324_v7, %v220_v17  ;;  %v1246_v19 = vpop.f32.mrb[2].mxu0  ;;  %v72_v17 = vld [vmem:[#allocation2 + $0x170] sm:$0xff] }
 0x172   :  { %v2089_v20 = vadd.f32 %v1246_v19, %v152_v13  ;;  %v229_v22 = vpop.f32.mrb[3].mxu0 }
 0x173   :  { %1886 = vtanh.f32 %v328_v18  ;;  %v230_v23 = vadd.f32 %v229_v22, %v152_v13  ;;  %v73_v18 = vld [vmem:[#allocation2 + $0x178] sm:$0xff]  ;;  %v75_v22 = vld [vmem:[#allocation2 + $0x188] sm:$0xff] }
 0x174   :  { %v1849_v19 = vpack.c.bf16 %v73_v18, %v72_v17 }
 0x175   :  { %v1249_v24 = vpop.f32.mrb[4].mxu0 }
 0x176   :  { %v2091_v26 = vadd.f32 %v1249_v24, %v152_v13  ;;  %v239_v27 = vpop.f32.mrb[5].mxu0  ;;  %v77_v24 = vld [vmem:[#allocation2 + $0x198] sm:$0xff] }
 0x177   :  { %v2093_v28 = vadd.f32 %v239_v27, %v152_v13  ;;  %v78_v27 = vld [vmem:[#allocation2 + $0x1a0] sm:$0xff] }
 0x179   :  { %v1252_v30 = vpop.f32.mrb[6].mxu0 }
 0x17a   :  { %v2095_v31 = vadd.f32 %v1252_v30, %v152_v13  ;;  %v249_v32 = vpop.f32.mrb[7].mxu0 }
 0x17b   :  { %v2097_v33 = vadd.f32 %v249_v32, %v152_v13  ;;  %v1843_v13 = vpack.c.bf16 %v69_v10, %v68_v8  ;;  %v80_v32 = vld [vmem:[#allocation2 + $0x1b0] sm:$0xff] }
 0x17d   :  { %v1887_v34 = vpop.eup %1886 }
 0x17e   :  { %1321 = vmatmul.mubr.f32.vlgmr.msra.gmra.mrb[8].mxu0 %v1887_v34 }
 0x17f   :  { %1709 = vmatpush3.bf16.msra.mxu0 %v1999_v12  ;;  %1390 = vmatprep.mubr.msk.f32.mxu0 %vm1955_vm0, %v1956_v25 }
 0x180   :  { %1710 = vmatprep.subr.bf16.mxu0 %v1954_v1 }
 0x183   :  { %1712 = vmatpush3.bf16.msra.mxu0 %v2008_v21 }
 0x184   :  { %1713 = vmatprep.subr.bf16.mxu0 %v1954_v1 }
 0x187   :  { %1715 = vmatpush3.bf16.msra.mxu0 %v2017_v29 }
 0x188   :  { %1716 = vmatprep.subr.bf16.mxu0 %v1954_v1 }
 0x18b   :  { %1718 = vmatpush3.bf16.msra.mxu0 %v2021_v35 }
 0x18c   :  { %1719 = vmatprep.subr.bf16.mxu0 %v1954_v1 }
 0x18f   :  { %1721 = vmatpush3.bf16.msra.mxu0 %v2028_v42 }
 0x190   :  { %1722 = vmatprep.subr.bf16.mxu0 %v1954_v1 }
 0x193   :  { %1724 = vmatpush3.bf16.msra.mxu0 %v2032_v48 }
 0x194   :  { %1725 = vmatprep.subr.bf16.mxu0 %v1954_v1 }
 0x197   :  { %1727 = vmatpush3.bf16.msra.mxu0 %v2036_v54 }
 0x198   :  { %1728 = vmatprep.subr.bf16.mxu0 %v1954_v1 }
 0x19b   :  { %1730 = vmatpush3.bf16.msra.mxu0 %v2040_v58 }
 0x19c   :  { %1755 = vmatprep.subr.bf16.mxu0 %v1954_v1 }
 0x251   :  { %v396_v36 = vpop.f32.mrb[8].mxu0 }
 0x252   :  { %v400_v37 = vadd.f32 %v396_v36, %v225_v15  ;;  %v1322_v38 = vpop.f32.mrb[9].mxu0  ;;  %v71_v15 = vld [vmem:[#allocation2 + $0x168] sm:$0xff]  ;;  %v82_v36 = vld [vmem:[#allocation2 + $0x1c0] sm:$0xff] }
 0x253   :  { %v1846_v16 = vpack.c.bf16 %v71_v15, %v70_v14 }
 0x254   :  { %1888 = vtanh.f32 %v400_v37  ;;  %v83_v37 = vld [vmem:[#allocation2 + $0x1c8] sm:$0xff] }
 0x255   :  { %v1864_v38 = vpack.c.bf16 %v83_v37, %v82_v36 }
 0x25e   :  { %v1889_v39 = vpop.eup %1888 }
 0x25f   :  { %1356 = vmatmul.mubr.f32.vlgmr.msra.gmra.mrb[2].mxu1 %v1889_v39  ;;  %v84_v39 = vld [vmem:[#allocation2 + $0x1d0] sm:$0xff] }
 0x260   :  { %1733 = vmatpush3.bf16.msra.mxu1 %v1999_v12  ;;  %1425 = vmatprep.mubr.msk.f32.mxu1 %vm1955_vm0, %v1956_v25 }
 0x261   :  { %1734 = vmatprep.subr.bf16.mxu1 %v1954_v1 }
 0x264   :  { %1736 = vmatpush3.bf16.msra.mxu1 %v2008_v21 }
 0x265   :  { %1737 = vmatprep.subr.bf16.mxu1 %v1954_v1 }
 0x268   :  { %1739 = vmatpush3.bf16.msra.mxu1 %v2017_v29 }
 0x269   :  { %1740 = vmatprep.subr.bf16.mxu1 %v1954_v1 }
 0x26c   :  { %1742 = vmatpush3.bf16.msra.mxu1 %v2021_v35 }
 0x26d   :  { %1743 = vmatprep.subr.bf16.mxu1 %v1954_v1 }
 0x270   :  { %1745 = vmatpush3.bf16.msra.mxu1 %v2028_v42 }
 0x271   :  { %1746 = vmatprep.subr.bf16.mxu1 %v1954_v1 }
 0x274   :  { %1748 = vmatpush3.bf16.msra.mxu1 %v2032_v48 }
 0x275   :  { %1749 = vmatprep.subr.bf16.mxu1 %v1954_v1 }
 0x278   :  { %1751 = vmatpush3.bf16.msra.mxu1 %v2036_v54 }
 0x279   :  { %1752 = vmatprep.subr.bf16.mxu1 %v1954_v1 }
 0x27c   :  { %1754 = vmatpush3.bf16.msra.mxu1 %v2040_v58 }
 0x27d   :  { %1779 = vmatprep.subr.bf16.mxu1 %v1954_v1 }
 0x332   :  { %v468_v40 = vpop.f32.mrb[2].mxu1 }
 0x333   :  { %v472_v41 = vadd.f32 %v468_v40, %v230_v23  ;;  %v1357_v43 = vpop.f32.mrb[3].mxu1  ;;  %v76_v23 = vld [vmem:[#allocation2 + $0x190] sm:$0xff]  ;;  %v85_v40 = vld [vmem:[#allocation2 + $0x1d8] sm:$0xff] }
 0x334   :  { %v86_v43 = vld [vmem:[#allocation2 + $0x1e0] sm:$0xff] }
 0x335   :  { %1890 = vtanh.f32 %v472_v41  ;;  %v1867_v41 = vpack.c.bf16 %v85_v40, %v84_v39 }
 0x33f   :  { %v1891_v44 = vpop.eup %1890 }
 0x340   :  { %1391 = vmatmul.mubr.f32.vlgmr.msra.gmra.mrb[10].mxu0 %v1891_v44  ;;  %v87_v44 = vld [vmem:[#allocation2 + $0x1e8] sm:$0xff] }
 0x341   :  { %1757 = vmatpush3.bf16.msra.mxu0 %v1999_v12  ;;  %1460 = vmatprep.mubr.msk.f32.mxu0 %vm1955_vm0, %v1956_v25 }
 0x342   :  { %1758 = vmatprep.subr.bf16.mxu0 %v1954_v1 }
 0x345   :  { %1760 = vmatpush3.bf16.msra.mxu0 %v2008_v21 }
 0x346   :  { %1761 = vmatprep.subr.bf16.mxu0 %v1954_v1 }
 0x349   :  { %1763 = vmatpush3.bf16.msra.mxu0 %v2017_v29 }
 0x34a   :  { %1764 = vmatprep.subr.bf16.mxu0 %v1954_v1 }
 0x34d   :  { %1766 = vmatpush3.bf16.msra.mxu0 %v2021_v35 }
 0x34e   :  { %1767 = vmatprep.subr.bf16.mxu0 %v1954_v1 }
 0x351   :  { %1769 = vmatpush3.bf16.msra.mxu0 %v2028_v42 }
 0x352   :  { %1770 = vmatprep.subr.bf16.mxu0 %v1954_v1 }
 0x355   :  { %1772 = vmatpush3.bf16.msra.mxu0 %v2032_v48 }
 0x356   :  { %1773 = vmatprep.subr.bf16.mxu0 %v1954_v1 }
 0x359   :  { %1775 = vmatpush3.bf16.msra.mxu0 %v2036_v54 }
 0x35a   :  { %1776 = vmatprep.subr.bf16.mxu0 %v1954_v1 }
 0x35d   :  { %1778 = vmatpush3.bf16.msra.mxu0 %v2040_v58 }
 0x35e   :  { %1803 = vmatprep.subr.bf16.mxu0 %v1954_v1 }
 0x413   :  { %v540_v45 = vpop.f32.mrb[10].mxu0 }
 0x414   :  { %v544_v46 = vadd.f32 %v540_v45, %v2089_v20  ;;  %v1392_v47 = vpop.f32.mrb[11].mxu0  ;;  %v74_v20 = vld [vmem:[#allocation2 + $0x180] sm:$0xff]  ;;  %v1870_v45 = vpack.c.bf16 %v87_v44, %v86_v43 }
 0x416   :  { %1892 = vtanh.f32 %v544_v46 }
 0x420   :  { %v1893_v49 = vpop.eup %1892 }
 0x421   :  { %1426 = vmatmul.mubr.f32.vlgmr.msra.gmra.mrb[4].mxu1 %v1893_v49 }
 0x422   :  { %1781 = vmatpush3.bf16.msra.mxu1 %v1999_v12  ;;  %1495 = vmatprep.mubr.msk.f32.mxu1 %vm1955_vm0, %v1956_v25 }
 0x423   :  { %1782 = vmatprep.subr.bf16.mxu1 %v1954_v1 }
 0x426   :  { %1784 = vmatpush3.bf16.msra.mxu1 %v2008_v21 }
 0x427   :  { %1785 = vmatprep.subr.bf16.mxu1 %v1954_v1 }
 0x42a   :  { %1787 = vmatpush3.bf16.msra.mxu1 %v2017_v29 }
 0x42b   :  { %1788 = vmatprep.subr.bf16.mxu1 %v1954_v1 }
 0x42e   :  { %1790 = vmatpush3.bf16.msra.mxu1 %v2021_v35 }
 0x42f   :  { %1791 = vmatprep.subr.bf16.mxu1 %v1954_v1 }
 0x432   :  { %1793 = vmatpush3.bf16.msra.mxu1 %v2028_v42 }
 0x433   :  { %1794 = vmatprep.subr.bf16.mxu1 %v1954_v1 }
 0x436   :  { %1796 = vmatpush3.bf16.msra.mxu1 %v2032_v48 }
 0x437   :  { %1797 = vmatprep.subr.bf16.mxu1 %v1954_v1 }
 0x43a   :  { %1799 = vmatpush3.bf16.msra.mxu1 %v2036_v54 }
 0x43b   :  { %1800 = vmatprep.subr.bf16.mxu1 %v1954_v1 }
 0x43e   :  { %1802 = vmatpush3.bf16.msra.mxu1 %v2040_v58 }
 0x43f   :  { %1827 = vmatprep.subr.bf16.mxu1 %v1954_v1 }
 0x4f4   :  { %v612_v50 = vpop.f32.mrb[4].mxu1 }
 0x4f5   :  { %v616_v51 = vadd.f32 %v612_v50, %v2093_v28  ;;  %v1427_v52 = vpop.f32.mrb[5].mxu1  ;;  %v79_v28 = vld [vmem:[#allocation2 + $0x1a8] sm:$0xff] }
 0x4f6   :  { %v1858_v30 = vpack.c.bf16 %v79_v28, %v78_v27  ;;  %v89_v52 = vld [vmem:[#allocation2 + $0x1f8] sm:$0xff] }
 0x4f7   :  { %1894 = vtanh.f32 %v616_v51  ;;  %v88_v51 = vld [vmem:[#allocation2 + $0x1f0] sm:$0xff] }
 0x501   :  { %v1895_v53 = vpop.eup %1894 }
 0x502   :  { %1461 = vmatmul.mubr.f32.vlgmr.msra.gmra.mrb[12].mxu0 %v1895_v53  ;;  %v1873_v53 = vpack.c.bf16 %v89_v52, %v88_v51 }
 0x503   :  { %1805 = vmatpush3.bf16.msra.mxu0 %v1999_v12  ;;  %1530 = vmatprep.mubr.msk.f32.mxu0 %vm1955_vm0, %v1956_v25 }
 0x504   :  { %1806 = vmatprep.subr.bf16.mxu0 %v1954_v1 }
 0x507   :  { %1808 = vmatpush3.bf16.msra.mxu0 %v2008_v21 }
 0x508   :  { %1809 = vmatprep.subr.bf16.mxu0 %v1954_v1 }
 0x50b   :  { %1811 = vmatpush3.bf16.msra.mxu0 %v2017_v29 }
 0x50c   :  { %1812 = vmatprep.subr.bf16.mxu0 %v1954_v1 }
 0x50f   :  { %1814 = vmatpush3.bf16.msra.mxu0 %v2021_v35 }
 0x510   :  { %1815 = vmatprep.subr.bf16.mxu0 %v1954_v1 }
 0x513   :  { %1817 = vmatpush3.bf16.msra.mxu0 %v2028_v42  ;;  %v58_v42 = vld [vmem:[#allocation2 + $0x100] sm:$0xff] }
 0x514   :  { %1818 = vmatprep.subr.bf16.mxu0 %v1954_v1 }
 0x517   :  { %1820 = vmatpush3.bf16.msra.mxu0 %v2032_v48  ;;  %v59_v48 = vld [vmem:[#allocation2 + $0x108] sm:$0xff] }
 0x518   :  { %1821 = vmatprep.subr.bf16.mxu0 %v1954_v1 }
 0x51b   :  { %1823 = vmatpush3.bf16.msra.mxu0 %v2036_v54  ;;  %v1828_v54 = vpack.c.bf16 %v59_v48, %v58_v42 }
 0x51c   :  { %1824 = vmatprep.subr.bf16.mxu0 %v1954_v1 }
 0x51f   :  { %1826 = vmatpush3.bf16.msra.mxu0 %v2040_v58  ;;  %v62_v58 = vld [vmem:[#allocation2 + $0x120] sm:$0xff] }
 0x520   :  { %1851 = vmatprep.subr.bf16.mxu0 %v1954_v1  ;;  %v1834_v60 = vpack.c.bf16 %v63_v59, %v62_v58 }
 0x5d5   :  { %v684_v12 = vpop.f32.mrb[12].mxu0 }
 0x5d6   :  { %v688_v21 = vadd.f32 %v684_v12, %v2091_v26  ;;  %v1462_v29 = vpop.f32.mrb[13].mxu0  ;;  %v1855_v26 = vpack.c.bf16 %v77_v24, %v76_v23  ;;  %v836_v12 = vsub.s32 1, %v2083_v9 }
 0x5d8   :  { %1896 = vtanh.f32 %v688_v21  ;;  %v837_v21 = vrot.slane %v2086_v11, %v836_v12 }
 0x5e2   :  { %v1897_v35 = vpop.eup %1896 }
 0x5e3   :  { %1496 = vmatmul.mubr.f32.vlgmr.msra.gmra.mrb[6].mxu1 %v1897_v35 }
 0x5e4   :  { %1565 = vmatprep.mubr.msk.f32.mxu1 %vm1955_vm0, %v1956_v25  ;;  %1829 = vmatpush3.bf16.msra.mxu1 %v1828_v54 }
 0x5e5   :  { %1830 = vmatprep.subr.bf16.mxu1 %v1954_v1 }
 0x5e8   :  { %1832 = vmatpush3.bf16.msra.mxu1 %v1831_v57 }
 0x5e9   :  { %1833 = vmatprep.subr.bf16.mxu1 %v1954_v1 }
 0x5ec   :  { %1835 = vmatpush3.bf16.msra.mxu1 %v1834_v60 }
 0x5ed   :  { %1836 = vmatprep.subr.bf16.mxu1 %v1954_v1 }
 0x5f0   :  { %1838 = vmatpush3.bf16.msra.mxu1 %v1837_v63 }
 0x5f1   :  { %1839 = vmatprep.subr.bf16.mxu1 %v1954_v1 }
 0x5f4   :  { %1841 = vmatpush3.bf16.msra.mxu1 %v1840_v3 }
 0x5f5   :  { %1842 = vmatprep.subr.bf16.mxu1 %v1954_v1 }
 0x5f8   :  { %1844 = vmatpush3.bf16.msra.mxu1 %v1843_v13 }
 0x5f9   :  { %1845 = vmatprep.subr.bf16.mxu1 %v1954_v1 }
 0x5fc   :  { %1847 = vmatpush3.bf16.msra.mxu1 %v1846_v16 }
 0x5fd   :  { %1848 = vmatprep.subr.bf16.mxu1 %v1954_v1 }
 0x600   :  { %1850 = vmatpush3.bf16.msra.mxu1 %v1849_v19 }
 0x6b6   :  { %v756_v4 = vpop.f32.mrb[6].mxu1 }
 0x6b7   :  { %v760_v5 = vadd.f32 %v756_v4, %v2097_v33  ;;  %v1497_v6 = vpop.f32.mrb[7].mxu1  ;;  %v81_v33 = vld [vmem:[#allocation2 + $0x1b8] sm:$0xff] }
 0x6b8   :  { %v1861_v34 = vpack.c.bf16 %v81_v33, %v80_v32 }
 0x6b9   :  { %1898 = vtanh.f32 %v760_v5 }
 0x6c3   :  { %v1899_v7 = vpop.eup %1898 }
 0x6c4   :  { %1531 = vmatmul.mubr.f32.vlgmr.msra.gmra.mrb[14].mxu0 %v1899_v7 }
 0x6c5   :  { %1600 = vmatprep.mubr.msk.f32.mxu0 %vm1955_vm0, %v1956_v25  ;;  %v1852_v25 = vpack.c.bf16 %v75_v22, %v74_v20 }
 0x6c7   :  { %1853 = vmatpush3.bf16.msra.mxu0 %v1852_v25 }
 0x6c8   :  { %1854 = vmatprep.subr.bf16.mxu0 %v1954_v1 }
 0x6cb   :  { %1856 = vmatpush3.bf16.msra.mxu0 %v1855_v26 }
 0x6cc   :  { %1857 = vmatprep.subr.bf16.mxu0 %v1954_v1 }
 0x6cf   :  { %1859 = vmatpush3.bf16.msra.mxu0 %v1858_v30 }
 0x6d0   :  { %1860 = vmatprep.subr.bf16.mxu0 %v1954_v1 }
 0x6d3   :  { %1862 = vmatpush3.bf16.msra.mxu0 %v1861_v34 }
 0x6d4   :  { %1863 = vmatprep.subr.bf16.mxu0 %v1954_v1 }
 0x6d7   :  { %1865 = vmatpush3.bf16.msra.mxu0 %v1864_v38 }
 0x6d8   :  { %1866 = vmatprep.subr.bf16.mxu0 %v1954_v1 }
 0x6db   :  { %1868 = vmatpush3.bf16.msra.mxu0 %v1867_v41 }
 0x6dc   :  { %1869 = vmatprep.subr.bf16.mxu0 %v1954_v1 }
 0x6df   :  { %1871 = vmatpush3.bf16.msra.mxu0 %v1870_v45 }
 0x6e0   :  { %1872 = vmatprep.subr.bf16.mxu0 %v1954_v1  ;;  %v911_v1 = vsub.s32 2, %v2083_v9 }
 0x6e3   :  { %1874 = vmatpush3.bf16.msra.mxu0 %v1873_v53 }
 0x797   :  { %v828_v46 = vpop.f32.mrb[14].mxu0 }
 0x798   :  { %v832_v47 = vadd.f32 %v828_v46, %v2095_v31  ;;  %v1532_v49 = vpop.f32.mrb[15].mxu0  ;;  %v912_v31 = vrot.slane %v2086_v11, %v911_v1 }
 0x79a   :  { %1900 = vtanh.f32 %v832_v47 }
 0x7a4   :  { %v1901_v50 = vpop.eup %1900 }
 0x7a5   :  { %1566 = vmatmul.mubr.f32.vlgmr.msra.gmra.mrb[8].mxu1 %v1901_v50 }
 0x878   :  { %v904_v29 = vpop.f32.mrb[8].mxu1 }
 0x879   :  { %v905_v35 = vadd.f32 %v904_v29, %v837_v21  ;;  %v1567_v42 = vpop.f32.mrb[9].mxu1 }
 0x87b   :  { %v908_v48 = vmax.f32 %v905_v35, 0.0 }
 0x87d   :  { %1601 = vmatmul.mubr.f32.vlgmr.msra.gmra.mrb[16].mxu0 %v908_v48 }
 0x950   :  { %v979_v55 = vpop.f32.mrb[16].mxu0 }
 0x951   :  { %v980_v54 = vadd.f32 %v979_v55, %v912_v31  ;;  %v1602_v56 = vpop.f32.mrb[17].mxu0 }
 0x953   :  { %983 = vst [vmem:[#allocation5] sm:$0xff] %v980_v54 }
 0x954   :  { %1935 = shalt.err (!%p1932_p12)
}
 0x955   :  { %s1936_s14 = scalar_lea.hbm %s2230_s2, 128 }
 0x956   :  { %p1937_p13 = scmp.ne.s32.totalorder %s2230_s2, %s1936_s14  ;;  %p1940_p0 = scmp.lt.u32.totalorder %s1936_s14, %s2230_s2 }
 0x958   :  { %p1942_p1 = pnand %p1940_p0, %p1937_p13 }
 0x95a   :  { %1945 = shalt.err (!%p1942_p1)
}
 0x95b   :  { %993 = dma.vmem_to_hbm [thread:$0]  %s991_s10, 128, %s2230_s2, [#allocation4]  }
 0x95c   :  { %1948 = dma.done.wait [#allocation4], 128  }
 0x95d   :  { %1949 = vsyncadd [#allocation4], 4294967168 }
 0x95e   :  { %997 = vsyncpa [#allocation3], 1 }
 0x95f   :  { %998 = vsyncpa [#allocation4], 1 }

</bundles_post_ra>
